<compile_context>
chip_gen: v7x
topology: tpu7x:2x2x1
jax: 0.10.0
libtpu: 0.0.40
codegen_flags: <defaults>
</compile_context>

<pallas_src>
import functools

import jax
import jax.numpy as jnp
from jax.experimental import pallas as pl
from jax.experimental.pallas import tpu as pltpu


_VMEM_LIMIT_BYTES = 32 * 1024 * 1024   # safe on v5e / v6e / v7x


@functools.lru_cache(maxsize=1)
def _block_bytes():
    """Per-buffer block-size target, keyed on the TPU generation."""
    try:
        kind = jax.devices()[0].device_kind.lower()
    except Exception:  # pragma: no cover - defensive
        kind = ""
    if "v6" in kind or "v7" in kind:
        return 4 << 20   # fast HBM: amortize the ~0.35 us per-grid-step cost
    return 2 << 20       # v5e and older: stay well inside scoped VMEM


def _sublane(dtype):
    # dtype-aware sublane multiple: 8 for f32, 16 for bf16/f16, 32 for int8.
    itemsize = jnp.dtype(dtype).itemsize
    return max(8, 32 // max(int(itemsize), 1))


def _round_up(x, m):
    return ((x + m - 1) // m) * m


# ----------------------------- kernel -----------------------------------

def _neg_scale_kernel(neg_alpha, g_ref, o_ref):
    # Native-dtype multiply: neg_alpha is a weak-typed Python float, so bf16
    # cotangents stay bf16 (no converts).  Exact for a single constant scale.
    o_ref[...] = (neg_alpha * g_ref[...]).astype(o_ref.dtype)


def _pallas_scale(g, neg_alpha, block_shape, grid, index_map, semantics):
    itemsize = jnp.dtype(g.dtype).itemsize
    n = int(g.size)
    return pl.pallas_call(
        functools.partial(_neg_scale_kernel, neg_alpha),
        out_shape=jax.ShapeDtypeStruct(g.shape, g.dtype),
        grid=grid,
        in_specs=[pl.BlockSpec(block_shape, index_map)],
        out_specs=pl.BlockSpec(block_shape, index_map),
        input_output_aliases={0: 0},     # scale in place on the cotangent
        cost_estimate=pl.CostEstimate(
            flops=n, transcendentals=0, bytes_accessed=2 * n * itemsize),
        compiler_params=pltpu.CompilerParams(
            dimension_semantics=semantics,
            vmem_limit_bytes=_VMEM_LIMIT_BYTES),
    )(g)


# --------------------------- tiling wrappers ------------------------------

def _scale_2d(g2, neg_alpha):
    """out = neg_alpha * g2 for a 2-D array with lane-dense tiling."""
    rows, cols = g2.shape
    itemsize = jnp.dtype(g2.dtype).itemsize
    sub = _sublane(g2.dtype)
    bb = _block_bytes()

    # Column tile: whole row width if a `sub`-row block fits the budget,
    # otherwise the largest 128-multiple that does (ragged tail is masked).
    max_tn = max(128, (bb // (sub * itemsize)) // 128 * 128)
    tn = cols if cols <= max_tn else max_tn

    # Row tile targeting ~block_bytes per buffer (multiple of `sub`, or full).
    tm = (bb // (tn * itemsize)) // sub * sub
    tm = max(tm, sub)
    if tm >= rows:
        tm = rows
    grid_m = pl.cdiv(rows, tm)
    grid_n = pl.cdiv(cols, tn)

    # v7x has two TensorCores: make sure a parallel axis has >= 2 steps when
    # there is enough work to split (harmless no-op on single-TC chips).
    if grid_m * grid_n == 1:
        if rows >= 2 * sub:
            tm = _round_up(pl.cdiv(rows, 2), sub)
            grid_m = pl.cdiv(rows, tm)
        elif cols >= 2 * 128:
            tn = _round_up(pl.cdiv(cols, 2), 128)
            grid_n = pl.cdiv(cols, tn)

    return _pallas_scale(g2, neg_alpha, (tm, tn), (grid_m, grid_n),
                         lambda i, j: (i, j), ("parallel", "parallel"))


def _scale_nd(g, neg_alpha):
    """out = neg_alpha * g on the ORIGINAL shape (rank >= 3, last dim not a
    multiple of 128).  Tiles only the leading dim; trailing dims are taken at
    full extent (always a legal block) -> no flatten / pad / relayout copies."""
    shape = g.shape
    ndim = g.ndim
    itemsize = jnp.dtype(g.dtype).itemsize
    bb = _block_bytes()
    lead = shape[0]
    trailing_bytes = itemsize
    for d in shape[1:]:
        trailing_bytes *= d

    tb = max(1, bb // max(trailing_bytes, 1))
    if tb >= lead:
        tb = lead
        if lead >= 2:            # give v7x's second TensorCore a block
            tb = pl.cdiv(lead, 2)
    grid = (pl.cdiv(lead, tb),)
    block = (tb,) + tuple(shape[1:])
    index_map = lambda i: (i,) + (0,) * (ndim - 1)
    return _pallas_scale(g, neg_alpha, block, grid, index_map, ("parallel",))


def _neg_scale_pallas(g, alpha):
    """Elementwise out = -alpha * g via a Pallas TPU kernel."""
    if g.size == 0:
        return g
    neg_alpha = -float(alpha)
    if g.ndim == 0:
        return _scale_2d(g.reshape(1, 1), neg_alpha).reshape(())
    if g.ndim == 1:
        # Adding a unit leading dim is free (layout-preserving).
        return _scale_2d(g.reshape(1, g.shape[0]), neg_alpha).reshape(g.shape)
    if g.ndim == 2:
        return _scale_2d(g, neg_alpha)
    if g.shape[-1] % 128 == 0:
        # Typical (B, S, D) activation gradient: free leading-dim collapse to
        # a lane-dense slab.
        d = g.shape[-1]
        return _scale_2d(g.reshape(-1, d), neg_alpha).reshape(g.shape)
    # Odd trailing dims (e.g. NCHW feature maps): keep the original shape.
    return _scale_nd(g, neg_alpha)


# ------------------------ GRL with custom VJP ----------------------------

@functools.partial(jax.custom_vjp, nondiff_argnums=(1,))
def grl(x, alpha=1.0):
    """Gradient reversal layer: identity forward, -alpha * grad backward."""
    return x  # identity forward: no kernel, no HBM traffic


def _grl_fwd(x, alpha):
    return x, None


def _grl_bwd(alpha, _, g):
    return (_neg_scale_pallas(g, alpha),)


grl.defvjp(_grl_fwd, _grl_bwd)


class GRL:
    """Mirror of the PyTorch GRL module (no parameters)."""

    def __init__(self, alpha=1.0):
        self.alpha = float(alpha)

    def __call__(self, x):
        return grl(x, self.alpha)


# -------------------------------- main -----------------------------------

if __name__ == "__main__":
    key = jax.random.PRNGKey(0)
    x = jax.random.normal(key, (2, 4, 16, 16), dtype=jnp.float32)  # NCHW-like

    layer = GRL(alpha=1.0)

    # Forward: identity (no kernel launched on purpose).
    y = jax.block_until_ready(layer(x))
    assert y.shape == x.shape and y.dtype == x.dtype
    assert bool(jnp.allclose(y, x)), "forward must be identity"

    # Backward (Pallas kernel, original-shape ND path): grad == -alpha * ones.
    gx = jax.block_until_ready(jax.grad(lambda x_: jnp.sum(grl(x_, 1.0)))(x))
    assert bool(jnp.allclose(gx, -jnp.ones_like(x))), \
        "backward must reverse gradient"

    # Non-unit alpha.
    gx2 = jax.block_until_ready(jax.grad(lambda x_: jnp.sum(grl(x_, 2.5)))(x))
    assert bool(jnp.allclose(gx2, -2.5 * jnp.ones_like(x)))

    # Lane-dense (B, S, D) path with a bf16 cotangent (native-dtype multiply).
    xb = jax.random.normal(jax.random.PRNGKey(1), (2, 8, 256),
                           dtype=jnp.float32).astype(jnp.bfloat16)
    gb = jax.block_until_ready(
        jax.grad(lambda x_: jnp.sum(grl(x_, 1.0).astype(jnp.float32)))(xb))
    assert gb.dtype == jnp.bfloat16
    assert bool(jnp.allclose(gb.astype(jnp.float32), -1.0))

    # Ragged / odd shapes exercise the no-pad fallback paths.
    x3 = jax.random.normal(jax.random.PRNGKey(2), (3, 5, 7), dtype=jnp.float32)
    g3 = jax.block_until_ready(jax.grad(lambda x_: jnp.sum(grl(x_, 1.0)))(x3))
    assert bool(jnp.allclose(g3, -jnp.ones_like(x3)))

    # 1-D, 128-aligned vector.
    x1 = jax.random.normal(jax.random.PRNGKey(3), (384,), dtype=jnp.float32)
    g1 = jax.block_until_ready(jax.grad(lambda x_: jnp.sum(grl(x_, 0.5)))(x1))
    assert bool(jnp.allclose(g1, -0.5 * jnp.ones_like(x1)))

    print("KERNEL_OK")
</pallas_src>

<mosaic_0001>
module attributes {stable_mosaic.version = 11 : i64} {
  func.func @_neg_scale_kernel(%arg0: i32, %arg1: memref<1x4x16x16xf32, #tpu.memory_space<vmem>>, %arg2: memref<1x4x16x16xf32, #tpu.memory_space<vmem>>) attributes {dimension_semantics = [#tpu.dimension_semantics<parallel>], iteration_bounds = array<i64: 2>, scalar_prefetch = 0 : i64, scratch_operands = 0 : i64, tpu.core_type = #tpu.core_type<tc>, window_params = [{transform_indices = @transform_0, window_bounds = array<i64: 1, 4, 16, 16>}, {transform_indices = @transform_1, window_bounds = array<i64: 1, 4, 16, 16>}]} {
    %c0 = arith.constant 0 : index
    %c0_0 = arith.constant 0 : index
    %c0_1 = arith.constant 0 : index
    %c0_2 = arith.constant 0 : index
    %0 = vector.load %arg1[%c0, %c0_0, %c0_1, %c0_2] : memref<1x4x16x16xf32, #tpu.memory_space<vmem>>, vector<1x4x16x16xf32>
    %cst = arith.constant -1.000000e+00 : f32
    %1 = vector.broadcast %cst : f32 to vector<1x4x16x16xf32>
    %2 = arith.mulf %1, %0 : vector<1x4x16x16xf32>
    %c0_3 = arith.constant 0 : index
    %c0_4 = arith.constant 0 : index
    %c0_5 = arith.constant 0 : index
    %c0_6 = arith.constant 0 : index
    %3 = vector.load %arg2[%c0_3, %c0_4, %c0_5, %c0_6] : memref<1x4x16x16xf32, #tpu.memory_space<vmem>>, vector<1x4x16x16xf32>
    tpu.vector_store %arg2[%c0_3, %c0_4, %c0_5, %c0_6], %2 {strides = array<i32>} : memref<1x4x16x16xf32, #tpu.memory_space<vmem>>, vector<1x4x16x16xf32>,
    return
  }
  func.func @transform_0(%arg0: i32) -> (i32, i32, i32, i32) {
    %c0_i32 = arith.constant 0 : i32
    %c0_i32_0 = arith.constant 0 : i32
    %c0_i32_1 = arith.constant 0 : i32
    %c0_i32_2 = arith.constant 0 : i32
    return %arg0, %c0_i32, %c0_i32_0, %c0_i32_1 : i32, i32, i32, i32
  }
  func.func @transform_1(%arg0: i32) -> (i32, i32, i32, i32) {
    %c0_i32 = arith.constant 0 : i32
    %c0_i32_0 = arith.constant 0 : i32
    %c0_i32_1 = arith.constant 0 : i32
    %c0_i32_2 = arith.constant 0 : i32
    return %arg0, %c0_i32, %c0_i32_0, %c0_i32_1 : i32, i32, i32, i32
  }
}

</mosaic_0001>

<bundles_post_ra>
// kernel: tpu_custom_call.1
= control target key start
LH: loop header
LB: loop body
LE: loop exit
PB: predicated region body
PF: predicated region fallthrough
CT: control target
= control target key end

     0   :  { %6 = vsyncpa [#allocation3], 0  ;;  %s597_s0 = inlined_call_operand.hbm [shape: f32[2,4,16,16], index: 0, kind: input, shape index: {}, may-alias: {0,1}]   ;;  %s598_s1 = inlined_call_operand.hbm [shape: f32[2,4,16,16], index: 1, kind: output, shape index: {}, may-alias: {0,1}]  }
   0x1   :  { %8 = vsyncpa [#allocation3 + $0x1], 0 }
   0x2   :  { %9 = vsyncpa [#allocation4], 0 }
   0x3   :  { %11 = vsyncpa [#allocation4 + $0x1], 0  ;;  %s427_s6 = smov 0   ;;  %s429_s7 = smov 0  }
   0x4   :  { %s431_s8 = smov 0   ;;  %s433_s9 = smov 0  }
   0x5 LB: > { %s448_s10 = sadd.s32 4294967295, %s409_s9   ;;  %s247_s11 = sadd.s32 4294967294, %s409_s9   ;;  %s409_s9 = sphi %s433_s9, %s611_s9   ;;  %s405_s8 = sphi %s431_s8, %s610_s8   ;;  %s401_s7 = sphi %s429_s7, %s609_s7   ;;  %s397_s6 = sphi %s427_s6, %s608_s6  }
   0x6   : > { %s452_s12 = sadd.s32 1, %s409_s9   ;;  %s24_s13 = sadd.s32 1, %s405_s8 }
   0x7   : > { %s21_s14 = ssub.s32 %s409_s9, %s452_s12  ;;  %p31_p0 = scmp.ne.s32.totalorder %s405_s8, %s401_s7 }
   0x8   : > { %p22_p1 = scmp.eq.s32.totalorder %s21_s14, 0  ;;  %p32_p2 = scmp.eq.s32.totalorder %s409_s9, 0 }
   0x9   : > { %p37_p3 = scmp.ne.s32.totalorder %s401_s7, %s397_s6  ;;  %p38_p4 = scmp.eq.s32.totalorder %s448_s10, 0 }
   0xa   : > { %s464_s15 = scalar_select %p22_p1, %s405_s8, %s24_s13  }
   0xb   : > { %p466_p5 = por %p32_p2, %p31_p0  ;;  %p470_p6 = por %p38_p4, %p37_p3 }
   0xc   : > { %p61_p7 = scmp.eq.s32.totalorder %s448_s10, 1  ;;  %p67_p8 = scmp.eq.s32.totalorder %s247_s11, 1 }
   0xd   : > { %p275_p10 = scmp.lt.s32.totalorder %s409_s9, 2  ;;  %s87_s20 = sand.u32 1, %s405_s8  }
   0xe   : > { %p477_p11 = por %p61_p7, %p31_p0  ;;  %p481_p12 = por %p67_p8, %p37_p3 }
   0xf   : > { %s261_s21 = sshll.u32 %s409_s9, 10  ;;  %s250_s22 = sshll.u32 %s87_s20, 6 }
  0x10   : > { %s602_s18 = scalar_select %p477_p11, 1, 0 }
  0x11   : > { %s603_s19 = scalar_select %p481_p12, 1, 0 }
  0x12   : > { %s490_s25 = scalar_lea.hbm %s597_s0, %s261_s21  ;;  %s91_s26 = scalar_lea.vmem [#allocation2], %s250_s22 }
  0x13   : > { %s98_s27 = sshll.u32 %s91_s26, 4  ;;  %p494_p13 = pnand %p275_p10, %p466_p5  ;;  %s498_s27 = int_to_ptr.vmem [resolvable:$true] %s98_s27 }
  0x14   : > { %s500_s29 = scalar_lea.sflag [#allocation3], %s87_s20  ;;  %s313_s30 = scalar_lea.hbm %s490_s25, 1024 }
  0x15   : > { %p314_p0 = scmp.ne.s32.totalorder %s490_s25, %s313_s30  ;;  %p315_p1 = pneg %p494_p13 }
  0x16   : > { %s318_s4 = scalar_lea.hbm %s597_s0, 2048  ;;  %p319_p4 = scmp.lt.u32.totalorder %s490_s25, %s597_s0 }
  0x17   : > { %p316_p2 = pnand %p315_p1, %p314_p0  ;;  %p320_p5 = scmp.lt.u32.totalorder %s318_s4, %s313_s30 }
  0x18   : > { %p322_p8 = scmp.lt.u32.totalorder %s313_s30, %s490_s25 }
  0x19   : > { %p317_p3 = pneg %p316_p2  ;;  %p321_p7 = por %p320_p5, %p319_p4 }
  0x1b   : > { %p323_p10 = por %p322_p8, %p321_p7 }
  0x1d   : > { %p324_p9 = pnand %p323_p10, %p317_p3 }
  0x1f   : > { %327 = shalt.err (!%p324_p9)
}
  0x20   : > { %s328_s13 = scalar_lea.vmem %s498_s27, 1024  ;;  %s411_s14 = smov [#allocation2]  }
  0x21   : > { %p329_p0 = scmp.ne.s32.totalorder %s498_s27, %s328_s13  ;;  %s333_s16 = sshll.u32 %s411_s14, 4  ;;  %s334_s16 = int_to_ptr.vmem [resolvable:$false] %s333_s16 }
  0x22   : > { %s335_s20 = scalar_lea.vmem %s334_s16, 2048  ;;  %p336_p11 = scmp.lt.s32.totalorder %s498_s27, %s334_s16 }
  0x23   : > { %p331_p2 = pnand %p329_p0, %p315_p1  ;;  %p337_p4 = scmp.lt.s32.totalorder %s335_s20, %s328_s13 }
  0x25   : > { %p332_p12 = pneg %p331_p2  ;;  %p338_p5 = por %p337_p4, %p336_p11 }
  0x27   : > { %p339_p7 = pnand %p338_p5, %p332_p12 }
  0x29   : > { %342 = shalt.err (!%p339_p7)
}
  0x2a   : > { %s412_s21 = smov 128   ;;  %s413_s22 = smov 8  }
  0x2b   : > { %270 = dma.hbm_to_vmem [thread:$0]  (!%p494_p13), %s490_s25, 1024, %s498_s27, %s500_s29, %s412_s21, %s412_s21, %s413_s22  }
  0x2c   : > { %p253_p9 = scmp.ge.s32.totalorder %s409_s9, 1  ;;  %p106_p1 = scmp.lt.s32.totalorder %s409_s9, 3 }
  0x2e   : > { %p107_p3 = pnand %p253_p9, %p106_p1 }
  0x2f   : > { %s531_s23 = sand.u32 (!%p107_p3), 1, %s401_s7  }
  0x30   : > { %110 = sbr.rel (%p107_p3) target bundleno = 84 (0x54), region = 24  ;;  %s254_s24 = sshll.u32 (!%p107_p3), %s531_s23, 6 }
  0x31   : > { %s113_s26 = scalar_lea.sflag (!%p107_p3), [#allocation3], %s531_s23  ;;  %s116_s30 = scalar_lea.vmem (!%p107_p3), [#allocation2], %s254_s24 }
  0x37   : > { %388 = dma.done.wait (%p470_p6), %s113_s26, 1024  }
  0x38   : > { %390 = vsyncadd (%p470_p6), %s113_s26, 4294966272  ;;  %s134_s25 = scalar_lea.vmem [#allocation5], %s254_s24  ;;  %s262_s28 = sshll.u32 %s448_s10, 10  ;;  %v135_v0 = vld [vmem:[%s116_s30] sm:$0xff]  ;;  %vm151_vm0 = vcmask 130048   ;;  %v136_v1 = vld [vmem:[%s116_s30 + $0x8] sm:$0xff] }
  0x39   : > { %s174_s27 = sshll.u32 %s134_s25, 4  ;;  %v137_v2 = vld [vmem:[%s116_s30 + $0x10] sm:$0xff]  ;;  %v143_v3 = vmul.f32 -1.0, %v135_v0  ;;  %v144_v4 = vmul.f32 -1.0, %v136_v1  ;;  %v138_v6 = vld [vmem:[%s116_s30 + $0x18] sm:$0xff]  ;;  %v139_v7 = vld [vmem:[%s116_s30 + $0x20] sm:$0xff]  ;;  %s545_s29 = scalar_lea.hbm %s598_s1, %s262_s28  ;;  %s540_s27 = int_to_ptr.vmem [resolvable:$true] %s174_s27 }
  0x3a   : > { %v145_v5 = vmul.f32 -1.0, %v137_v2  ;;  %v140_v8 = vld [vmem:[%s116_s30 + $0x28] sm:$0xff]  ;;  %v146_v9 = vmul.f32 -1.0, %v138_v6  ;;  %v147_v10 = vmul.f32 -1.0, %v139_v7  ;;  %v141_v12 = vld [vmem:[%s116_s30 + $0x30] sm:$0xff]  ;;  %v142_v13 = vld [vmem:[%s116_s30 + $0x38] sm:$0xff] }
  0x3b   : > { %v148_v11 = vmul.f32 -1.0, %v140_v8  ;;  %152 = vst.msk [vmem:[%s134_s25] sm:$0xff] %vm151_vm0, %v143_v3  ;;  %153 = vst.msk [vmem:[%s134_s25 + $0x8] sm:$0xff] %vm151_vm0, %v144_v4  ;;  %v149_v14 = vmul.f32 -1.0, %v141_v12  ;;  %v150_v15 = vmul.f32 -1.0, %v142_v13  ;;  %s161_s2 = scalar_lea.sflag [#allocation4], %s531_s23 }
  0x3c   : > { %154 = vst.msk [vmem:[%s134_s25 + $0x10] sm:$0xff] %vm151_vm0, %v145_v5  ;;  %155 = vst.msk [vmem:[%s134_s25 + $0x18] sm:$0xff] %vm151_vm0, %v146_v9  ;;  %s343_s3 = scalar_lea.vmem %s540_s27, 1024  ;;  %p605_p11 = scmp.ne.s32.totalorder %s602_s18, 0 }
  0x3d   : > { %156 = vst.msk [vmem:[%s134_s25 + $0x20] sm:$0xff] %vm151_vm0, %v147_v10  ;;  %157 = vst.msk [vmem:[%s134_s25 + $0x28] sm:$0xff] %vm151_vm0, %v148_v11  ;;  %p344_p6 = scmp.ne.s32.totalorder %s540_s27, %s343_s3  ;;  %s414_s4 = smov [#allocation5]  }
  0x3e   : > { %158 = vst.msk [vmem:[%s134_s25 + $0x30] sm:$0xff] %vm151_vm0, %v149_v14  ;;  %159 = vst.msk [vmem:[%s134_s25 + $0x38] sm:$0xff] %vm151_vm0, %v150_v15  ;;  %s347_s5 = sshll.u32 %s414_s4, 4  ;;  %s348_s5 = int_to_ptr.vmem [resolvable:$false] %s347_s5 }
  0x3f   : > { %p345_p12 = pnand %p344_p6, %p605_p11  ;;  %s349_s11 = scalar_lea.vmem %s348_s5, 2048 }
  0x40   : > { %p350_p8 = scmp.lt.s32.totalorder %s540_s27, %s348_s5  ;;  %p351_p10 = scmp.lt.s32.totalorder %s349_s11, %s343_s3 }
  0x41   : > { %p346_p13 = pneg %p345_p12 }
  0x42   : > { %p352_p0 = por %p351_p10, %p350_p8 }
  0x44   : > { %p353_p2 = pnand %p352_p0, %p346_p13 }
  0x46   : > { %356 = shalt.err (!%p353_p2)
}
  0x47   : > { %s357_s13 = scalar_lea.hbm %s545_s29, 1024  ;;  %s361_s20 = scalar_lea.hbm %s598_s1, 2048 }
  0x48   : > { %p358_p4 = scmp.ne.s32.totalorder %s545_s29, %s357_s13  ;;  %p362_p9 = scmp.lt.u32.totalorder %s545_s29, %s598_s1 }
  0x49   : > { %p363_p1 = scmp.lt.u32.totalorder %s361_s20, %s357_s13  ;;  %p365_p6 = scmp.lt.u32.totalorder %s357_s13, %s545_s29 }
  0x4a   : > { %p359_p5 = pnand %p358_p4, %p605_p11 }
  0x4b   : > { %p364_p3 = por %p363_p1, %p362_p9 }
  0x4c   : > { %p360_p7 = pneg %p359_p5 }
  0x4d   : > { %p366_p12 = por %p365_p6, %p364_p3 }
  0x4f   : > { %p367_p13 = pnand %p366_p12, %p360_p7 }
  0x51   : > { %370 = shalt.err (!%p367_p13)
}
  0x52   : > { %s415_s24 = smov 128   ;;  %s416_s26 = smov 8  }
  0x53   : > { %265 = dma.vmem_to_hbm [thread:$0]  (%p605_p11), %s540_s27, 1024, %s545_s29, %s161_s2, %s415_s24, %s415_s24, %s416_s26  }
  0x54 PF: > { %s189_s30 = sand.u32 1, %s397_s6   ;;  %p606_p8 = scmp.ne.s32.totalorder %s603_s19, 0 }
  0x55   : > { %p607_p10 = scmp.ge.s32.totalorder %s409_s9, 2  ;;  %s190_s25 = scalar_lea.sflag [#allocation4], %s189_s30 }
  0x57   : > { %p272_p0 = pnand %p607_p10, %p606_p8 }
  0x59   : > { %392 = dma.done.wait (!%p272_p0), %s190_s25, 1024  }
  0x5a   : > { %394 = vsyncadd (!%p272_p0), %s190_s25, 4294966272  ;;  %p14_p2 = scmp.ge.s32.totalorder %s452_s12, 4   ;;  %s608_s6 = smov %s401_s7 }
  0x5b   : > { %s609_s7 = smov %s405_s8  ;;  %s610_s8 = smov %s464_s15 }
  0x5c   : > { %s611_s9 = smov %s452_s12  ;;  %16 = sbr.rel (!%p14_p2) target bundleno = 5 (0x5), region = 69 }
  0x63   :  { %195 = vsyncpa [#allocation3], 1 }
  0x64   :  { %197 = vsyncpa [#allocation3 + $0x1], 1 }
  0x65   :  { %198 = vsyncpa [#allocation4], 1 }
  0x66   :  { %200 = vsyncpa [#allocation4 + $0x1], 1 }

</bundles_post_ra>
